<compile_context>
chip_gen: v7x
topology: tpu7x:2x2x1
jax: 0.10.0
libtpu: 0.0.40
codegen_flags: <defaults>
</compile_context>

<pallas_src>
import functools

import jax
import jax.numpy as jnp
from jax import lax
from jax.experimental import pallas as pl
from jax.experimental.pallas import tpu as pltpu

LANE = 128      # vreg lane width  -> last-dim padding target for stored outputs
SUBLANE = 8     # vreg sublane width -> padding target for node / feature dims


def _round_up(x, m):
    return (x + m - 1) // m * m


# ---------------------------------------------------------------------------
# Fused Pallas kernel: conv1 -> relu -> conv2 -> relu -> mean-pool -> linear -> log_softmax
# ---------------------------------------------------------------------------
def fused_gcn_kernel(num_classes,
                     a_ref, x_ref, w1_ref, b1_ref, w2_ref, b2_ref,
                     pool_ref, wl_ref, bl_ref,
                     hg_ref, logp_ref):
    """bf16 matmul operands, f32 accumulation. Padded rows/cols are zeros.

    h1   = relu(A_hat @ (X  @ W1) + b1)
    h2   = relu(A_hat @ (h1 @ W2) + b2)
    hG   = P @ h2                          (global mean pool as a matmul)
    logp = log_softmax(hG @ Wl + bl)       (padded class lanes masked in f32)
    """
    a = a_ref[...]                                   # (Np, Np) bf16

    # ---- GCNConv 1 (dropout = identity in eval mode) ----
    xw = jnp.dot(x_ref[...], w1_ref[...], preferred_element_type=jnp.float32)
    h1 = jnp.dot(a, xw.astype(jnp.bfloat16),
                 preferred_element_type=jnp.float32) + b1_ref[...]
    h1 = jnp.maximum(h1, 0.0).astype(jnp.bfloat16)   # stays vreg-resident

    # ---- GCNConv 2 ----
    hw = jnp.dot(h1, w2_ref[...], preferred_element_type=jnp.float32)
    h2 = jnp.dot(a, hw.astype(jnp.bfloat16),
                 preferred_element_type=jnp.float32) + b2_ref[...]
    h2 = jnp.maximum(h2, 0.0)

    # ---- global mean pool + Linear + log_softmax (f32 math) ----
    hg = jnp.dot(pool_ref[...], h2.astype(jnp.bfloat16),
                 preferred_element_type=jnp.float32)
    hg_ref[...] = hg
    logits = jnp.dot(hg.astype(jnp.bfloat16), wl_ref[...],
                     preferred_element_type=jnp.float32) + bl_ref[...]
    # mask padded class lanes so they don't contaminate the softmax (f32, no overflow)
    class_ids = lax.broadcasted_iota(jnp.int32, logits.shape, dimension=1)
    logits = jnp.where(class_ids < num_classes, logits, jnp.float32(-1e30))
    m = jnp.max(logits, axis=-1, keepdims=True)
    z = logits - m
    lse = jnp.log(jnp.sum(jnp.exp(z), axis=-1, keepdims=True))
    logp_ref[...] = z - lse


# ---------------------------------------------------------------------------
# Plain-JAX glue: graph -> dense normalized adjacency, batch -> pooling matrix
# ---------------------------------------------------------------------------
def normalized_adjacency(edge_index, num_nodes):
    """A_hat = D^-1/2 (A + I) D^-1/2  (GCNConv default: add_self_loops, symmetric norm)."""
    src, dst = edge_index[0], edge_index[1]
    a = jnp.zeros((num_nodes, num_nodes), jnp.float32).at[dst, src].add(1.0)
    a = a + jnp.eye(num_nodes, dtype=jnp.float32)
    deg = jnp.sum(a, axis=1)
    dinv = jnp.where(deg > 0, 1.0 / jnp.sqrt(deg), 0.0)
    return dinv[:, None] * a * dinv[None, :]


def mean_pool_matrix(batch, num_graphs, num_nodes):
    """P[g, n] = 1/|graph g| if batch[n] == g else 0."""
    onehot = jax.nn.one_hot(batch, num_graphs, dtype=jnp.float32).T  # (G, N)
    counts = jnp.sum(onehot, axis=1, keepdims=True)
    return onehot / jnp.maximum(counts, 1.0)


# ---------------------------------------------------------------------------
# One-time parameter padding / casting (hoisted out of the per-call path)
# ---------------------------------------------------------------------------
def pad_gcn_params(params):
    f, h = params["w1"].shape
    c = params["w_lin"].shape[1]
    fp = _round_up(f, SUBLANE)     # input-feature dim: sublane padding only
    hp = _round_up(h, LANE)        # hidden dim: lane-dense (hG output last dim)
    cp = _round_up(c, LANE)        # class dim: lane-dense (logp output last dim)

    padded = {
        "w1": jnp.zeros((fp, hp), jnp.bfloat16).at[:f, :h].set(
            params["w1"].astype(jnp.bfloat16)),
        "b1": jnp.zeros((1, hp), jnp.float32).at[:, :h].set(params["b1"]),
        "w2": jnp.zeros((hp, hp), jnp.bfloat16).at[:h, :h].set(
            params["w2"].astype(jnp.bfloat16)),
        "b2": jnp.zeros((1, hp), jnp.float32).at[:, :h].set(params["b2"]),
        "w_lin": jnp.zeros((hp, cp), jnp.bfloat16).at[:h, :c].set(
            params["w_lin"].astype(jnp.bfloat16)),
        "b_lin": jnp.zeros((1, cp), jnp.float32).at[:, :c].set(params["b_lin"]),
    }
    dims = {"f": f, "h": h, "c": c, "fp": fp, "hp": hp, "cp": cp}
    return padded, dims


# ---------------------------------------------------------------------------
# Wrapper: pad activations (sublane only), run ONE fused pallas_call, slice back
# ---------------------------------------------------------------------------
def gcn_forward(x, edge_index, batch, padded_params, dims, num_graphs):
    n, f = x.shape
    assert f == dims["f"]
    fp, hp, cp = dims["fp"], dims["hp"], dims["cp"]
    np_ = _round_up(n, SUBLANE)              # node dim: sublane padding only
    gp = _round_up(num_graphs, SUBLANE)

    a_hat = normalized_adjacency(edge_index, n)
    pool = mean_pool_matrix(batch, num_graphs, n)

    # zero-pad: padded node columns of A_hat / pool are exact zeros (invariant above);
    # padded classes are masked inside the kernel; padded graphs sliced off below.
    a_p = jnp.zeros((np_, np_), jnp.bfloat16).at[:n, :n].set(a_hat.astype(jnp.bfloat16))
    x_p = jnp.zeros((np_, fp), jnp.bfloat16).at[:n, :f].set(x.astype(jnp.bfloat16))
    pool_p = jnp.zeros((gp, np_), jnp.bfloat16).at[:num_graphs, :n].set(
        pool.astype(jnp.bfloat16))

    p = padded_params

    # advisory cost estimate (padded shapes)
    flops = 2 * (np_ * fp * hp + np_ * np_ * hp        # conv1
                 + np_ * hp * hp + np_ * np_ * hp      # conv2
                 + gp * np_ * hp + gp * hp * cp)       # pool + linear
    transcendentals = gp * cp + gp                     # exp + log in log_softmax
    bytes_in = (2 * (np_ * np_ + np_ * fp + fp * hp + hp * hp + gp * np_ + hp * cp)
                + 4 * (hp + hp + cp))                  # bf16 operands + f32 biases
    bytes_out = 4 * (gp * hp + gp * cp)
    bytes_accessed = bytes_in + bytes_out

    # per-generation VMEM clamp (64 MiB on v7x, 128 MiB on v5e/v6e); ~1.5x provisioning
    try:
        vmem_cap = int(pltpu.get_tpu_info().vmem_capacity_bytes)
    except Exception:
        vmem_cap = 64 * 1024 * 1024
    vmem_limit = int(min(int(vmem_cap * 0.9),
                         max(16 * 1024 * 1024, int(1.5 * bytes_accessed) + (1 << 20))))

    vmem_spec = pl.BlockSpec(memory_space=pltpu.MemorySpace.VMEM)
    hg_p, logp_p = pl.pallas_call(
        functools.partial(fused_gcn_kernel, dims["c"]),
        out_shape=(
            jax.ShapeDtypeStruct((gp, hp), jnp.float32),
            jax.ShapeDtypeStruct((gp, cp), jnp.float32),
        ),
        in_specs=[vmem_spec] * 9,
        out_specs=(vmem_spec, vmem_spec),
        compiler_params=pltpu.CompilerParams(vmem_limit_bytes=vmem_limit),
        cost_estimate=pl.CostEstimate(
            flops=flops,
            transcendentals=transcendentals,
            bytes_accessed=bytes_accessed,
        ),
    )(a_p, x_p, p["w1"], p["b1"], p["w2"], p["b2"], pool_p, p["w_lin"], p["b_lin"])

    hG = hg_p[:num_graphs, :dims["h"]]
    logp = logp_p[:num_graphs, :dims["c"]]
    return hG, logp


# ---------------------------------------------------------------------------
# Pure-JAX f32 reference (for correctness check)
# ---------------------------------------------------------------------------
def gcn_forward_ref(x, edge_index, batch, params, num_graphs):
    a_hat = normalized_adjacency(edge_index, x.shape[0])
    pool = mean_pool_matrix(batch, num_graphs, x.shape[0])
    h = jnp.maximum(a_hat @ (x @ params["w1"]) + params["b1"], 0.0)
    h = jnp.maximum(a_hat @ (h @ params["w2"]) + params["b2"], 0.0)
    hG = pool @ h
    logits = hG @ params["w_lin"] + params["b_lin"]
    return hG, jax.nn.log_softmax(logits, axis=1)


# ---------------------------------------------------------------------------
if __name__ == "__main__":
    # Small synthetic problem: 2 graphs of 8 nodes each (undirected ring graphs)
    NUM_NODES = 16
    NUM_FEATURES = 8       # dataset.num_node_features
    DIM_H = 32
    NUM_CLASSES = 4        # dataset.num_classes
    NUM_GRAPHS = 2

    key = jax.random.PRNGKey(0)
    kx, k1, k2, k3 = jax.random.split(key, 4)

    # node features
    x = jax.random.normal(kx, (NUM_NODES, NUM_FEATURES), jnp.float32)

    # undirected ring edges inside each graph of 8 nodes
    edges = []
    for g in range(NUM_GRAPHS):
        base = g * 8
        for i in range(8):
            a, b = base + i, base + (i + 1) % 8
            edges.append((a, b))
            edges.append((b, a))
    edge_index = jnp.array(edges, dtype=jnp.int32).T            # (2, E)
    batch = jnp.array([0] * 8 + [1] * 8, dtype=jnp.int32)        # (N,)

    # deterministic parameters (weights stored as (in, out); PyTorch Linear uses (out, in)
    # and computes x @ W.T — equivalent)
    params = {
        "w1": jax.random.normal(k1, (NUM_FEATURES, DIM_H), jnp.float32) * 0.1,
        "b1": jnp.zeros((1, DIM_H), jnp.float32),
        "w2": jax.random.normal(k2, (DIM_H, DIM_H), jnp.float32) * 0.1,
        "b2": jnp.zeros((1, DIM_H), jnp.float32),
        "w_lin": jax.random.normal(k3, (DIM_H, NUM_CLASSES), jnp.float32) * 0.1,
        "b_lin": jnp.zeros((1, NUM_CLASSES), jnp.float32),
    }

    # pad / cast the static weights ONCE
    padded_params, dims = pad_gcn_params(params)

    hG, logp = gcn_forward(x, edge_index, batch, padded_params, dims, NUM_GRAPHS)
    jax.block_until_ready((hG, logp))

    hG_ref, logp_ref = gcn_forward_ref(x, edge_index, batch, params, NUM_GRAPHS)
    assert hG.shape == (NUM_GRAPHS, DIM_H)
    assert logp.shape == (NUM_GRAPHS, NUM_CLASSES)
    # bf16 MXU operands with f32 accumulation -> loosened tolerances
    assert jnp.allclose(hG, hG_ref, atol=3e-2, rtol=3e-2)
    assert jnp.allclose(logp, logp_ref, atol=3e-2, rtol=3e-2)

    print("KERNEL_OK")
</pallas_src>

<mosaic_0001>
module attributes {stable_mosaic.version = 11 : i64} {
  func.func @fused_gcn_kernel(%arg0: memref<16x16xbf16, #tpu.memory_space<vmem>>, %arg1: memref<16x8xbf16, #tpu.memory_space<vmem>>, %arg2: memref<8x128xbf16, #tpu.memory_space<vmem>>, %arg3: memref<1x128xf32, #tpu.memory_space<vmem>>, %arg4: memref<128x128xbf16, #tpu.memory_space<vmem>>, %arg5: memref<1x128xf32, #tpu.memory_space<vmem>>, %arg6: memref<8x16xbf16, #tpu.memory_space<vmem>>, %arg7: memref<128x128xbf16, #tpu.memory_space<vmem>>, %arg8: memref<1x128xf32, #tpu.memory_space<vmem>>, %arg9: memref<8x128xf32, #tpu.memory_space<vmem>>, %arg10: memref<8x128xf32, #tpu.memory_space<vmem>>) attributes {dimension_semantics = [], scalar_prefetch = 0 : i64, scratch_operands = 0 : i64, tpu.core_type = #tpu.core_type<tc>} {
    %c0 = arith.constant 0 : index
    %c0_0 = arith.constant 0 : index
    %0 = vector.load %arg0[%c0, %c0_0] : memref<16x16xbf16, #tpu.memory_space<vmem>>, vector<16x16xbf16>
    %c0_1 = arith.constant 0 : index
    %c0_2 = arith.constant 0 : index
    %1 = vector.load %arg1[%c0_1, %c0_2] : memref<16x8xbf16, #tpu.memory_space<vmem>>, vector<16x8xbf16>
    %c0_3 = arith.constant 0 : index
    %c0_4 = arith.constant 0 : index
    %2 = vector.load %arg2[%c0_3, %c0_4] : memref<8x128xbf16, #tpu.memory_space<vmem>>, vector<8x128xbf16>
    %cst = arith.constant dense<0.000000e+00> : vector<16x128xf32>
    %3 = tpu.matmul %1, %2, %cst {dimension_numbers = #tpu.dot_dimension_numbers<[1], [0], [0], [1], [0, 0, 1, 1], [], []>} : vector<16x8xbf16>, vector<8x128xbf16>, vector<16x128xf32> -> vector<16x128xf32>
    %4 = arith.truncf %3 : vector<16x128xf32> to vector<16x128xbf16>
    %cst_5 = arith.constant dense<0.000000e+00> : vector<16x128xf32>
    %5 = tpu.matmul %0, %4, %cst_5 {dimension_numbers = #tpu.dot_dimension_numbers<[1], [0], [0], [1], [0, 0, 1, 1], [], []>} : vector<16x16xbf16>, vector<16x128xbf16>, vector<16x128xf32> -> vector<16x128xf32>
    %c0_6 = arith.constant 0 : index
    %c0_7 = arith.constant 0 : index
    %6 = vector.load %arg3[%c0_6, %c0_7] : memref<1x128xf32, #tpu.memory_space<vmem>>, vector<1x128xf32>
    %7 = vector.broadcast %6 : vector<1x128xf32> to vector<16x128xf32>
    %8 = arith.addf %5, %7 : vector<16x128xf32>
    %cst_8 = arith.constant 0.000000e+00 : f32
    %9 = vector.broadcast %cst_8 : f32 to vector<16x128xf32>
    %10 = arith.maximumf %8, %9 : vector<16x128xf32>
    %11 = arith.truncf %10 : vector<16x128xf32> to vector<16x128xbf16>
    %c0_9 = arith.constant 0 : index
    %c0_10 = arith.constant 0 : index
    %12 = vector.load %arg4[%c0_9, %c0_10] : memref<128x128xbf16, #tpu.memory_space<vmem>>, vector<128x128xbf16>
    %cst_11 = arith.constant dense<0.000000e+00> : vector<16x128xf32>
    %13 = tpu.matmul %11, %12, %cst_11 {dimension_numbers = #tpu.dot_dimension_numbers<[1], [0], [0], [1], [0, 0, 1, 1], [], []>} : vector<16x128xbf16>, vector<128x128xbf16>, vector<16x128xf32> -> vector<16x128xf32>
    %14 = arith.truncf %13 : vector<16x128xf32> to vector<16x128xbf16>
    %cst_12 = arith.constant dense<0.000000e+00> : vector<16x128xf32>
    %15 = tpu.matmul %0, %14, %cst_12 {dimension_numbers = #tpu.dot_dimension_numbers<[1], [0], [0], [1], [0, 0, 1, 1], [], []>} : vector<16x16xbf16>, vector<16x128xbf16>, vector<16x128xf32> -> vector<16x128xf32>
    %c0_13 = arith.constant 0 : index
    %c0_14 = arith.constant 0 : index
    %16 = vector.load %arg5[%c0_13, %c0_14] : memref<1x128xf32, #tpu.memory_space<vmem>>, vector<1x128xf32>
    %17 = vector.broadcast %16 : vector<1x128xf32> to vector<16x128xf32>
    %18 = arith.addf %15, %17 : vector<16x128xf32>
    %cst_15 = arith.constant 0.000000e+00 : f32
    %19 = vector.broadcast %cst_15 : f32 to vector<16x128xf32>
    %20 = arith.maximumf %18, %19 : vector<16x128xf32>
    %c0_16 = arith.constant 0 : index
    %c0_17 = arith.constant 0 : index
    %21 = vector.load %arg6[%c0_16, %c0_17] : memref<8x16xbf16, #tpu.memory_space<vmem>>, vector<8x16xbf16>
    %22 = arith.truncf %20 : vector<16x128xf32> to vector<16x128xbf16>
    %cst_18 = arith.constant dense<0.000000e+00> : vector<8x128xf32>
    %23 = tpu.matmul %21, %22, %cst_18 {dimension_numbers = #tpu.dot_dimension_numbers<[1], [0], [0], [1], [0, 0, 1, 1], [], []>} : vector<8x16xbf16>, vector<16x128xbf16>, vector<8x128xf32> -> vector<8x128xf32>
    %c0_19 = arith.constant 0 : index
    %c0_20 = arith.constant 0 : index
    %24 = vector.load %arg9[%c0_19, %c0_20] : memref<8x128xf32, #tpu.memory_space<vmem>>, vector<8x128xf32>
    tpu.vector_store %arg9[%c0_19, %c0_20], %23 {strides = array<i32>} : memref<8x128xf32, #tpu.memory_space<vmem>>, vector<8x128xf32>,
    %25 = arith.truncf %23 : vector<8x128xf32> to vector<8x128xbf16>
    %c0_21 = arith.constant 0 : index
    %c0_22 = arith.constant 0 : index
    %26 = vector.load %arg7[%c0_21, %c0_22] : memref<128x128xbf16, #tpu.memory_space<vmem>>, vector<128x128xbf16>
    %cst_23 = arith.constant dense<0.000000e+00> : vector<8x128xf32>
    %27 = tpu.matmul %25, %26, %cst_23 {dimension_numbers = #tpu.dot_dimension_numbers<[1], [0], [0], [1], [0, 0, 1, 1], [], []>} : vector<8x128xbf16>, vector<128x128xbf16>, vector<8x128xf32> -> vector<8x128xf32>
    %c0_24 = arith.constant 0 : index
    %c0_25 = arith.constant 0 : index
    %28 = vector.load %arg8[%c0_24, %c0_25] : memref<1x128xf32, #tpu.memory_space<vmem>>, vector<1x128xf32>
    %29 = vector.broadcast %28 : vector<1x128xf32> to vector<8x128xf32>
    %30 = arith.addf %27, %29 : vector<8x128xf32>
    %31 = tpu.iota {dimensions = array<i32: 1>} : vector<8x128xi32>
    %c4_i32 = arith.constant 4 : i32
    %32 = vector.broadcast %c4_i32 : i32 to vector<8x128xi32>
    %33 = arith.cmpi slt, %31, %32 : vector<8x128xi32>
    %cst_26 = arith.constant -1.000000e+30 : f32
    %34 = vector.broadcast %cst_26 : f32 to vector<8x128xf32>
    %35 = arith.select %33, %30, %34 : vector<8x128xi1>, vector<8x128xf32>
    %cst_27 = arith.constant dense<0xFF800000> : vector<8xf32>
    %36 = vector.multi_reduction <maximumf>, %35, %cst_27 [1] : vector<8x128xf32> to vector<8xf32>
    %37 = vector.shape_cast %36 : vector<8xf32> to vector<8x1xf32>
    %38 = vector.broadcast %37 : vector<8x1xf32> to vector<8x128xf32>
    %39 = arith.subf %35, %38 : vector<8x128xf32>
    %40 = math.exp %39 : vector<8x128xf32>
    %cst_28 = arith.constant dense<0.000000e+00> : vector<8xf32>
    %41 = vector.multi_reduction <add>, %40, %cst_28 [1] : vector<8x128xf32> to vector<8xf32>
    %42 = vector.shape_cast %41 : vector<8xf32> to vector<8x1xf32>
    %43 = math.log %42 : vector<8x1xf32>
    %44 = vector.broadcast %43 : vector<8x1xf32> to vector<8x128xf32>
    %45 = arith.subf %39, %44 : vector<8x128xf32>
    %c0_29 = arith.constant 0 : index
    %c0_30 = arith.constant 0 : index
    %46 = vector.load %arg10[%c0_29, %c0_30] : memref<8x128xf32, #tpu.memory_space<vmem>>, vector<8x128xf32>
    tpu.vector_store %arg10[%c0_29, %c0_30], %45 {strides = array<i32>} : memref<8x128xf32, #tpu.memory_space<vmem>>, vector<8x128xf32>,
    return
  }
}

</mosaic_0001>

<bundles_post_ra>
// kernel: tpu_custom_call.1
= control target key start
LH: loop header
LB: loop body
LE: loop exit
PB: predicated region body
PF: predicated region fallthrough
CT: control target
= control target key end

     0   :  { %16 = vsyncpa [#allocation3], 0  ;;  %s952_s0 = inlined_call_operand.vmem [shape: bf16[16,16], index: 0, kind: input, shape index: {}]   ;;  %s953_s1 = inlined_call_operand.vmem [shape: bf16[16,8], index: 1, kind: input, shape index: {}]   ;;  %s954_s2 = inlined_call_operand.vmem [shape: bf16[8,128], index: 2, kind: input, shape index: {}]   ;;  %s955_s3 = inlined_call_operand.vmem [shape: f32[1,128], index: 3, kind: input, shape index: {}]   ;;  %s956_s4 = inlined_call_operand.hbm [shape: bf16[128,128], index: 4, kind: input, shape index: {}]   ;;  %s957_s5 = inlined_call_operand.vmem [shape: f32[1,128], index: 5, kind: input, shape index: {}]   ;;  %s958_s6 = inlined_call_operand.vmem [shape: bf16[8,16], index: 6, kind: input, shape index: {}]   ;;  %s959_s7 = inlined_call_operand.hbm [shape: bf16[128,128], index: 7, kind: input, shape index: {}]   ;;  %s960_s8 = inlined_call_operand.vmem [shape: f32[1,128], index: 8, kind: input, shape index: {}]   ;;  %s961_s9 = inlined_call_operand.hbm [shape: f32[8,128], index: 9, kind: output, shape index: {0}]   ;;  %s962_s10 = inlined_call_operand.hbm [shape: f32[8,128], index: 10, kind: output, shape index: {1}]  }
   0x1   :  { %17 = vsyncpa [#allocation6], 0 }
   0x2   :  { %18 = vsyncpa [#allocation4], 0 }
   0x3   :  { %19 = vsyncpa [#allocation9], 0  ;;  %s785_s13 = smov [#allocation2]   ;;  %s689_s17 = scalar_lea.hbm %s956_s4, 1024 }
   0x4   :  { %s33_s14 = sshll.u32 %s785_s13, 4  ;;  %p690_p0 = scmp.ne.s32.totalorder %s956_s4, %s689_s17  ;;  %s34_s14 = int_to_ptr.vmem [resolvable:$true] %s33_s14 }
   0x5   :  { %p693_p1 = scmp.lt.u32.totalorder %s689_s17, %s956_s4 }
   0x7   :  { %p695_p2 = pnand %p693_p1, %p690_p0 }
   0x9   :  { %698 = shalt.err (!%p695_p2)
}
   0xa   :  { %s699_s22 = scalar_lea.vmem %s34_s14, 1024  ;;  %p704_p4 = scmp.lt.s32.totalorder %s34_s14, %s34_s14 }
   0xb   :  { %p700_p3 = scmp.ne.s32.totalorder %s34_s14, %s699_s22  ;;  %p705_p5 = scmp.lt.s32.totalorder %s699_s22, %s699_s22 }
   0xd   :  { %p706_p6 = por %p705_p5, %p704_p4 }
   0xf   :  { %p707_p7 = pnand %p706_p6, %p700_p3 }
  0x11   :  { %710 = shalt.err (!%p707_p7)
}
  0x12   :  { %s786_s23 = smov 64   ;;  %s787_s24 = smov 4  }
  0x13   :  { %39 = dma.hbm_to_vmem [thread:$0]  %s956_s4, 1024, %s34_s14, [#allocation3], %s786_s23, %s786_s23, %s787_s24  }
  0x14   :  { %s788_s27 = smov [#allocation5]   ;;  %s711_s11 = scalar_lea.hbm %s959_s7, 1024 }
  0x15   :  { %s49_s28 = sshll.u32 %s788_s27, 4  ;;  %p712_p8 = scmp.ne.s32.totalorder %s959_s7, %s711_s11  ;;  %s50_s28 = int_to_ptr.vmem [resolvable:$true] %s49_s28 }
  0x16   :  { %p715_p9 = scmp.lt.u32.totalorder %s711_s11, %s959_s7 }
  0x18   :  { %p717_p10 = pnand %p715_p9, %p712_p8 }
  0x1a   :  { %720 = shalt.err (!%p717_p10)
}
  0x1b   :  { %s721_s17 = scalar_lea.vmem %s50_s28, 1024  ;;  %p726_p12 = scmp.lt.s32.totalorder %s50_s28, %s50_s28 }
  0x1c   :  { %p722_p11 = scmp.ne.s32.totalorder %s50_s28, %s721_s17  ;;  %p727_p13 = scmp.lt.s32.totalorder %s721_s17, %s721_s17 }
  0x1e   :  { %p728_p0 = por %p727_p13, %p726_p12 }
  0x20   :  { %p729_p1 = pnand %p728_p0, %p722_p11 }
  0x22   :  { %732 = shalt.err (!%p729_p1)
}
  0x23   :  { %55 = dma.hbm_to_vmem [thread:$0]  %s959_s7, 1024, %s50_s28, [#allocation6], %s786_s23, %s786_s23, %s787_s24  }
  0x24   :  { %777 = dma.done.wait [#allocation3], 1024  }
  0x25   :  { %778 = vsyncadd [#allocation3], 4294966272 }
  0x26   :  { %779 = dma.done.wait [#allocation6], 1024  }
  0x27   :  { %780 = vsyncadd [#allocation6], 4294966272  ;;  %v789_v0 = vmov 0.0   ;;  %vm790_vm0 = vmmov 0   ;;  %vm79_vm1 = vcmask 1043456   ;;  %vm75_vm2 = vcmask 64512  }
  0x28   :  { %595 = vmatprep.subr.bf16.mxu0 %v789_v0  ;;  %597 = vmatprep.mubr.msk.bf16.mxu0 %vm790_vm0, %v789_v0  ;;  %v69_v1 = vld [vmem:[%s954_s2] sm:$0xf]  ;;  %vm137_vm3 = vcmask 130048   ;;  %v670_v11 = vld [vmem:[#allocation2 + $0x8] sm:$0xff]   ;;  %v671_v12 = vld [vmem:[#allocation2 + $0x10] sm:$0xff]   ;;  %v499_v57 = vlaneseq  ;;  %s791_s25 = smov [#allocation7]  }
  0x29   :  { %627 = vmatprep.subr.bf16.mxu1 %v789_v0  ;;  %629 = vmatprep.mubr.msk.bf16.mxu1 %vm790_vm0, %v789_v0  ;;  %v81_v2 = vsel %vm79_vm1, %v69_v1, 0  ;;  %v667_v3 = vld [vmem:[%s953_s1] sm:$0xff]   ;;  %v672_v13 = vld [vmem:[#allocation2 + $0x18] sm:$0xff]   ;;  %v674_v15 = vld [vmem:[#allocation2 + $0x28] sm:$0xff]   ;;  %s520_s26 = sshll.u32 %s791_s25, 4  ;;  %s521_s26 = int_to_ptr.vmem [resolvable:$true] %s520_s26 }
  0x2a   :  { %596 = vmatpush3.bf16.msra.mxu0 %v81_v2  ;;  %v668_v9 = vld [vmem:[%s952_s0] sm:$0xff]   ;;  %v675_v16 = vld [vmem:[#allocation2 + $0x30] sm:$0xff]   ;;  %v676_v17 = vld [vmem:[#allocation2 + $0x38] sm:$0xff]   ;;  %v500_v58 = vand.u32 127, %v499_v57  ;;  %s733_s27 = scalar_lea.vmem %s521_s26, 128  ;;  %p738_p3 = scmp.lt.s32.totalorder %s521_s26, %s521_s26 }
  0x2b   :  { %601 = vmatprep.subr.bf16.mxu0 %v789_v0  ;;  %v669_v10 = vld [vmem:[#allocation2] sm:$0xff]   ;;  %v678_v45 = vld [vmem:[#allocation5 + $0x8] sm:$0xff]   ;;  %v679_v46 = vld [vmem:[#allocation5 + $0x10] sm:$0xff]   ;;  %p734_p2 = scmp.ne.s32.totalorder %s521_s26, %s733_s27  ;;  %p739_p4 = scmp.lt.s32.totalorder %s733_s27, %s733_s27 }
  0x2c   :  { %v673_v14 = vld [vmem:[#allocation2 + $0x20] sm:$0xff]   ;;  %v680_v47 = vld [vmem:[#allocation5 + $0x18] sm:$0xff]   ;;  %v682_v49 = vld [vmem:[#allocation5 + $0x28] sm:$0xff]   ;;  %vm501_vm4 = vcmp.lt.s32.totalorder %v500_v58, 4 }
  0x2d   :  { %598 = vmatmul.mubr.msk.bf16.vlgmr.msra.gmra.mrb[0].mxu0 %vm75_vm2, %v667_v3  ;;  %v546_v18 = vld [vmem:[%s955_s3] ss:$0 sm:$0xff]  ;;  %v683_v50 = vld [vmem:[#allocation5 + $0x30] sm:$0xff]   ;;  %v684_v51 = vld [vmem:[#allocation5 + $0x38] sm:$0xff]   ;;  %p740_p5 = por %p739_p4, %p738_p3 }
  0x2e   :  { %603 = vmatprep.mubr.msk.bf16.mxu0 %vm790_vm0, %v789_v0  ;;  %v557_v33 = vld [vmem:[%s957_s5] ss:$0 sm:$0xff] }
  0x2f   :  { %v341_v43 = vld [vmem:[%s958_s6] sm:$0xf]  ;;  %p741_p6 = pnand %p740_p5, %p734_p2 }
  0x30   :  { %v677_v44 = vld [vmem:[#allocation5] sm:$0xff]  }
  0x31   :  { %v681_v48 = vld [vmem:[#allocation5 + $0x20] sm:$0xff]  }
  0x32   :  { %v560_v59 = vld [vmem:[%s960_s8] ss:$0 sm:$0xff] }
 0x100   :  { %v117_v4 = vpop.f32.mrb[0].mxu0 }
 0x101   :  { %v599_v5 = vpop.f32.mrb[1].mxu0 }
 0x102   :  { %v120_v6 = vpop.f32.mrb[2].mxu0 }
 0x103   :  { %v124_v7 = vpack.c.bf16 %v120_v6, %v117_v4  ;;  %v600_v8 = vpop.f32.mrb[3].mxu0 }
 0x105   :  { %602 = vmatpush3.bf16.msra.mxu0 %v124_v7 }
 0x106   :  { %607 = vmatprep.subr.bf16.mxu0 %v789_v0 }
 0x108   :  { %604 = vmatmul.mubr.msk.bf16.vlgmr.msra.gmra.mrb[4].mxu0 %vm137_vm3, %v668_v9 }
 0x109   :  { %608 = vmatpush3.bf16.msra.mxu0 %v669_v10  ;;  %623 = vmatprep.mubr.msk.bf16.mxu0 %vm790_vm0, %v789_v0 }
 0x10a   :  { %609 = vmatprep.subr.bf16.mxu0 %v789_v0 }
 0x10d   :  { %610 = vmatpush3.bf16.msra.mxu0 %v670_v11 }
 0x10e   :  { %611 = vmatprep.subr.bf16.mxu0 %v789_v0 }
 0x111   :  { %612 = vmatpush3.bf16.msra.mxu0 %v671_v12 }
 0x112   :  { %613 = vmatprep.subr.bf16.mxu0 %v789_v0 }
 0x115   :  { %614 = vmatpush3.bf16.msra.mxu0 %v672_v13 }
 0x116   :  { %615 = vmatprep.subr.bf16.mxu0 %v789_v0 }
 0x119   :  { %616 = vmatpush3.bf16.msra.mxu0 %v673_v14 }
 0x11a   :  { %617 = vmatprep.subr.bf16.mxu0 %v789_v0 }
 0x11d   :  { %618 = vmatpush3.bf16.msra.mxu0 %v674_v15 }
 0x11e   :  { %619 = vmatprep.subr.bf16.mxu0 %v789_v0 }
 0x121   :  { %620 = vmatpush3.bf16.msra.mxu0 %v675_v16 }
 0x122   :  { %621 = vmatprep.subr.bf16.mxu0 %v789_v0 }
 0x125   :  { %622 = vmatpush3.bf16.msra.mxu0 %v676_v17 }
 0x1db   :  { %v175_v19 = vpop.f32.mrb[4].mxu0 }
 0x1dc   :  { %v176_v20 = vadd.f32 %v546_v18, %v175_v19  ;;  %v605_v21 = vpop.f32.mrb[5].mxu0 }
 0x1dd   :  { %v178_v22 = vpop.f32.mrb[6].mxu0 }
 0x1de   :  { %v179_v23 = vadd.f32 %v546_v18, %v178_v22  ;;  %v606_v24 = vpop.f32.mrb[7].mxu0  ;;  %v182_v25 = vmax.f32 %v176_v20, 0.0 }
 0x1e0   :  { %v183_v26 = vmax.f32 %v179_v23, 0.0 }
 0x1e2   :  { %v184_v27 = vpack.c.bf16 %v183_v26, %v182_v25 }
 0x1e4   :  { %624 = vmatmul.mubr.bf16.vlgmr.msra.gmra.mrb[8].mxu0 %v184_v27 }
 0x2b7   :  { %v283_v28 = vpop.f32.mrb[8].mxu0 }
 0x2b8   :  { %v625_v29 = vpop.f32.mrb[9].mxu0 }
 0x2b9   :  { %v286_v30 = vpop.f32.mrb[10].mxu0 }
 0x2ba   :  { %v290_v31 = vpack.c.bf16 %v286_v30, %v283_v28  ;;  %v626_v32 = vpop.f32.mrb[11].mxu0 }
 0x2bc   :  { %628 = vmatpush3.bf16.msra.mxu1 %v290_v31 }
 0x2bd   :  { %633 = vmatprep.subr.bf16.mxu1 %v789_v0 }
 0x2bf   :  { %630 = vmatmul.mubr.msk.bf16.vlgmr.msra.gmra.mrb[0].mxu1 %vm137_vm3, %v668_v9 }
 0x2c0   :  { %635 = vmatprep.mubr.msk.bf16.mxu1 %vm790_vm0, %v789_v0 }
 0x392   :  { %v332_v34 = vpop.f32.mrb[0].mxu1 }
 0x393   :  { %v333_v35 = vadd.f32 %v557_v33, %v332_v34  ;;  %v631_v36 = vpop.f32.mrb[1].mxu1 }
 0x394   :  { %v335_v37 = vpop.f32.mrb[2].mxu1 }
 0x395   :  { %v336_v38 = vadd.f32 %v557_v33, %v335_v37  ;;  %v632_v39 = vpop.f32.mrb[3].mxu1  ;;  %v339_v40 = vmax.f32 %v333_v35, 0.0 }
 0x397   :  { %v340_v41 = vmax.f32 %v336_v38, 0.0 }
 0x399   :  { %v342_v42 = vpack.c.bf16 %v340_v41, %v339_v40 }
 0x39b   :  { %634 = vmatpush3.bf16.msra.mxu1 %v342_v42 }
 0x39c   :  { %639 = vmatprep.subr.bf16.mxu1 %v789_v0 }
 0x39e   :  { %636 = vmatmul.mubr.msk.bf16.vlgmr.msra.gmra.mrb[4].mxu1 %vm137_vm3, %v341_v43 }
 0x39f   :  { %640 = vmatpush3.bf16.msra.mxu1 %v677_v44  ;;  %655 = vmatprep.mubr.msk.bf16.mxu1 %vm790_vm0, %v789_v0 }
 0x3a0   :  { %641 = vmatprep.subr.bf16.mxu1 %v789_v0 }
 0x3a3   :  { %642 = vmatpush3.bf16.msra.mxu1 %v678_v45 }
 0x3a4   :  { %643 = vmatprep.subr.bf16.mxu1 %v789_v0 }
 0x3a7   :  { %644 = vmatpush3.bf16.msra.mxu1 %v679_v46 }
 0x3a8   :  { %645 = vmatprep.subr.bf16.mxu1 %v789_v0 }
 0x3ab   :  { %646 = vmatpush3.bf16.msra.mxu1 %v680_v47 }
 0x3ac   :  { %647 = vmatprep.subr.bf16.mxu1 %v789_v0 }
 0x3af   :  { %648 = vmatpush3.bf16.msra.mxu1 %v681_v48 }
 0x3b0   :  { %649 = vmatprep.subr.bf16.mxu1 %v789_v0 }
 0x3b3   :  { %650 = vmatpush3.bf16.msra.mxu1 %v682_v49 }
 0x3b4   :  { %651 = vmatprep.subr.bf16.mxu1 %v789_v0 }
 0x3b7   :  { %652 = vmatpush3.bf16.msra.mxu1 %v683_v50 }
 0x3b8   :  { %653 = vmatprep.subr.bf16.mxu1 %v789_v0 }
 0x3bb   :  { %654 = vmatpush3.bf16.msra.mxu1 %v684_v51 }
 0x471   :  { %v380_v52 = vpop.f32.mrb[4].mxu1 }
 0x472   :  { %v387_v53 = vpack.c.bf16 %v380_v52, %v380_v52  ;;  %386 = vst [vmem:[#allocation7] sm:$0xff] %v380_v52  ;;  %v637_v54 = vpop.f32.mrb[5].mxu1 }
 0x473   :  { %v383_v55 = vpop.f32.mrb[6].mxu1 }
 0x474   :  { %656 = vmatmul.mubr.bf16.vlgmr.msra.gmra.mrb[8].mxu1 %v387_v53  ;;  %v638_v56 = vpop.f32.mrb[7].mxu1 }
 0x547   :  { %v493_v60 = vpop.f32.mrb[8].mxu1 }
 0x548   :  { %v494_v61 = vadd.f32 %v560_v59, %v493_v60  ;;  %v657_v62 = vpop.f32.mrb[9].mxu1 }
 0x549   :  { %v496_v63 = vpop.f32.mrb[10].mxu1 }
 0x54a   :  { %v502_v0 = vsel %vm501_vm4, %v494_v61, -1e+30  ;;  %v658_v1 = vpop.f32.mrb[11].mxu1 }
 0x54b   :  { %503 = vmax.xlane.f32.xlu0 %v502_v0 }
 0x5d8   :  { %v504_v2 = vpop.xlane.xlu0 %503 }
 0x5d9   :  { %v505_v3 = vsub.f32 %v502_v0, %v504_v2 }
 0x5db   :  { %v506_v4 = vmul.f32 1.442695, %v505_v3 }
 0x5dd   :  { %685 = vpow2.f32 %v506_v4 }
 0x5e7   :  { %v686_v5 = vpop.eup %685 }
 0x5e8   :  { %508 = vadd.xlane.f32.xlu0 %v686_v5 }
 0x5e9   :  { %744 = shalt.err (!%p741_p6)
}
 0x5ea   :  { %s745_s29 = scalar_lea.hbm %s961_s9, 128 }
 0x5eb   :  { %p746_p7 = scmp.ne.s32.totalorder %s961_s9, %s745_s29  ;;  %p749_p8 = scmp.lt.u32.totalorder %s745_s29, %s961_s9 }
 0x5ed   :  { %p751_p9 = pnand %p749_p8, %p746_p7 }
 0x5ef   :  { %754 = shalt.err (!%p751_p9)
}
 0x5f0   :  { %523 = dma.vmem_to_hbm [thread:$0]  %s521_s26, 128, %s961_s9, [#allocation4]  }
 0x5f1   :  { %s792_s17 = smov [#allocation8]  }
 0x5f2   :  { %s530_s4 = sshll.u32 %s792_s17, 4  ;;  %s531_s4 = int_to_ptr.vmem [resolvable:$true] %s530_s4 }
 0x5f3   :  { %s755_s14 = scalar_lea.vmem %s531_s4, 128  ;;  %p760_p11 = scmp.lt.s32.totalorder %s531_s4, %s531_s4 }
 0x5f4   :  { %p756_p10 = scmp.ne.s32.totalorder %s531_s4, %s755_s14  ;;  %p761_p12 = scmp.lt.s32.totalorder %s755_s14, %s755_s14 }
 0x5f6   :  { %p762_p13 = por %p761_p12, %p760_p11 }
 0x5f8   :  { %p763_p0 = pnand %p762_p13, %p756_p10 }
 0x675   :  { %v509_v6 = vpop.xlane.xlu0 %508 }
 0x676   :  { %687 = vlog2.f32 %v509_v6 }
 0x680   :  { %v688_v7 = vpop.eup %687 }
 0x681   :  { %v511_v8 = vmul.f32 0.6931472, %v688_v7 }
 0x683   :  { %v512_v9 = vsub.f32 %v505_v3, %v511_v8 }
 0x685   :  { %513 = vst [vmem:[#allocation8] sm:$0xff] %v512_v9 }
 0x686   :  { %766 = shalt.err (!%p763_p0)
}
 0x687   :  { %s767_s9 = scalar_lea.hbm %s962_s10, 128 }
 0x688   :  { %p768_p1 = scmp.ne.s32.totalorder %s962_s10, %s767_s9  ;;  %p771_p2 = scmp.lt.u32.totalorder %s767_s9, %s962_s10 }
 0x68a   :  { %p773_p3 = pnand %p771_p2, %p768_p1 }
 0x68c   :  { %776 = shalt.err (!%p773_p3)
}
 0x68d   :  { %533 = dma.vmem_to_hbm [thread:$0]  %s531_s4, 128, %s962_s10, [#allocation9]  }
 0x68e   :  { %781 = dma.done.wait [#allocation4], 128  }
 0x68f   :  { %782 = vsyncadd [#allocation4], 4294967168 }
 0x690   :  { %783 = dma.done.wait [#allocation9], 128  }
 0x691   :  { %784 = vsyncadd [#allocation9], 4294967168 }
 0x692   :  { %540 = vsyncpa [#allocation3], 1 }
 0x693   :  { %541 = vsyncpa [#allocation6], 1 }
 0x694   :  { %542 = vsyncpa [#allocation4], 1 }
 0x695   :  { %543 = vsyncpa [#allocation9], 1 }

</bundles_post_ra>
